<compile_context>
chip_gen: v7x
topology: tpu7x:2x2x1
jax: 0.10.0
libtpu: 0.0.40
codegen_flags: <defaults>
</compile_context>

<pallas_src>
import functools

import numpy as np
import jax
import jax.numpy as jnp
from jax import lax
from jax.experimental import pallas as pl
from jax.experimental.pallas import tpu as pltpu


def _partial_sums_kernel(y_ref, x_ref, s_ref, fn_ref, *, n_batch):
    """Per-core streaming reductions over the batch.

    Accumulates into the resident output blocks (one block per outer index):
      s_ref  (C, D): per-class sum of x rows   (S[c] = sum_{i: y_i=c} x_i)
      fn_ref (1, D): row-reduced sum of x*x    (sum_i x_i^2, per lane)
    """
    f32 = jnp.float32
    i = pl.program_id(1)

    @pl.when(i == 0)
    def _init():
        s_ref[...] = jnp.zeros_like(s_ref)
        fn_ref[...] = jnp.zeros_like(fn_ref)

    # Global (unclamped) tile index; tiles past the end of the batch (ragged
    # last tile, or the clamped overflow tile on the second core) are masked.
    t = pl.program_id(0) * pl.num_programs(1) + i
    tile_b = x_ref.shape[0]
    row0 = t * tile_b

    x = x_ref[...]                                           # (tB, D) f32
    yv = y_ref[...]                                          # (1, tB) int32
    C = s_ref.shape[0]

    valid_row = (lax.broadcasted_iota(jnp.int32, (tile_b, 1), 0) + row0) < n_batch
    valid_lane = (lax.broadcasted_iota(jnp.int32, (1, tile_b), 1) + row0) < n_batch

    # Mask with jnp.where (not multiply) so garbage/NaN in the out-of-range
    # region of a partial tile can never leak into the sums.
    xm = jnp.where(valid_row, x, 0.0)

    # one-hot^T (C, tB) lhs for the per-class gather-sum matmul.
    class_iota = lax.broadcasted_iota(jnp.int32, (C, tile_b), 0)
    onehot_t = ((class_iota == yv) & valid_lane).astype(f32)

    s_ref[...] += jnp.dot(onehot_t, xm, preferred_element_type=f32)    # (C, D)
    fn_ref[...] += jnp.sum(xm * xm, axis=0, keepdims=True)             # (1, D)


def structure_loss(x, center, y, *, alpha=0.95, margin=1.0):
    """Returns (loss_center, loss_push, loss_gpush, new_center).

    `new_center` is the updated center buffer (the PyTorch module mutates
    self.center in place; here it is returned functionally).
    """
    f32 = jnp.float32
    x = jnp.asarray(x, f32)
    center = jnp.asarray(center, f32)
    y = jnp.asarray(y, jnp.int32)
    B, D = x.shape
    C, Dc = center.shape
    assert D == Dc and y.shape == (B,)

    # ---- tile sizing: target a few MiB per grid step, 128-row aligned ------
    bytes_per_row = 4 * (2 * D + C + 16)   # dbl-buffered x + (C,tB) one-hot + labels
    tB = (4 * 1024 * 1024) // max(bytes_per_row, 1)
    tB = max(128, min(2048, (tB // 128) * 128))
    if B <= tB:
        tB = B                             # single tile covers the whole batch
    nblocks = pl.cdiv(B, tB)
    n_cores = 2                            # dual-TC split for v7x; harmless on v5e/v6e
    n_inner = pl.cdiv(nblocks, n_cores)

    def x_map(o, i):
        return (jnp.minimum(o * n_inner + i, nblocks - 1), 0)

    def y_map(o, i):
        return (0, jnp.minimum(o * n_inner + i, nblocks - 1))

    # ---- VMEM budget (stay well under v7x's 64 MiB physical VMEM) ----------
    est = 4 * (2 * tB * D + 2 * tB + 2 * C * tB + 2 * C * D + 2 * D) + (2 << 20)
    cap = 48 * 1024 * 1024
    try:
        cap = min(cap, int(pltpu.get_tpu_info().vmem_capacity_bytes) * 3 // 4)
    except Exception:
        pass
    vmem_limit = int(min(cap, max(2 * est, 16 * 1024 * 1024)))
    # TODO(synk): for very large C*D the resident (C, D) accumulator itself no
    # longer fits VMEM; that regime needs an additional class-blocking grid axis.

    kernel = functools.partial(_partial_sums_kernel, n_batch=B)
    s_parts, fn_parts = pl.pallas_call(
        kernel,
        grid=(n_cores, n_inner),
        in_specs=[
            pl.BlockSpec((1, tB), y_map),              # labels, (1, B) int32
            pl.BlockSpec((tB, D), x_map),              # features, streamed as-is
        ],
        out_specs=[
            pl.BlockSpec((None, C, D), lambda o, i: (o, 0, 0)),  # per-core class sums
            pl.BlockSpec((None, 1, D), lambda o, i: (o, 0, 0)),  # per-core sum of x^2
        ],
        out_shape=(jax.ShapeDtypeStruct((n_cores, C, D), f32),
                   jax.ShapeDtypeStruct((n_cores, 1, D), f32)),
        compiler_params=pltpu.CompilerParams(
            dimension_semantics=("parallel", "arbitrary"),
            vmem_limit_bytes=vmem_limit),
    )(y.reshape(1, B), x)

    # ---- tiny O(C*D) / O(B) epilogue in plain XLA ---------------------------
    S = jnp.sum(s_parts, axis=0)                     # (C, D)  sum_{i: y_i=c} x_i
    sumfn = jnp.sum(fn_parts)                        # scalar  sum_i ||x_i||^2
    colsum = jnp.sum(S, axis=0)                      # (D,)    sum_i x_i

    counts = jnp.zeros((C,), f32).at[y].add(1.0)                      # O(B) scatter-add
    last_idx = jnp.full((C,), -1, jnp.int32).at[y].max(
        jnp.arange(B, dtype=jnp.int32))                               # O(B) scatter-max
    present = last_idx >= 0
    x_last = x[jnp.clip(last_idx, 0, B - 1)]         # (C, D) gather of C rows only
    c_new = jnp.where(present[:, None],
                      (1.0 - alpha) * (x_last - center), center)

    Bf, Cf, Df = float(B), float(C), float(D)
    # loss_center: exact per-class decomposition of sum_i ||x_i - c_new[y_i]||^2
    cross = jnp.sum(S * c_new)                       # sum_i x_i . c_new[y_i]
    sq = jnp.sum(counts[:, None] * (c_new * c_new))  # sum_i ||c_new[y_i]||^2
    loss_center = (sumfn - 2.0 * cross + sq) / (Bf * Df)

    # loss_push: mean pairwise feature distance, analytic form
    mean_fd = (2.0 * Bf * sumfn - 2.0 * jnp.sum(colsum * colsum)) / (Bf * Bf)
    loss_push = jax.nn.relu(-mean_fd + loss_center + margin)

    # loss_gpush: mean feature-to-center distance, analytic form
    csum = jnp.sum(c_new, axis=0)
    mean_fcd = (Cf * sumfn + Bf * jnp.sum(c_new * c_new)
                - 2.0 * jnp.sum(colsum * csum)) / (Bf * Cf)
    loss_gpush = jax.nn.relu(-mean_fcd + 2.0 * loss_center + margin)

    return loss_center, loss_push, loss_gpush, c_new


def _reference(x, center, y, alpha=0.95, margin=1.0):
    # pure-JAX re-implementation of the PyTorch forward (last-write-wins scatter)
    B, D = x.shape
    cb = center[y]
    diff = (1.0 - alpha) * (x - cb)
    new_center = center
    for i in range(B):
        new_center = new_center.at[y[i]].set(diff[i])
    cb = new_center[y]
    loss_center = jnp.mean((x - cb) ** 2)
    fnorm = jnp.sum(x ** 2, axis=1, keepdims=True)
    cnorm = jnp.sum(new_center ** 2, axis=1, keepdims=True)
    feat_diff = fnorm + fnorm.T - 2.0 * (x @ x.T)
    loss_push = jax.nn.relu(-jnp.mean(feat_diff) + loss_center + margin)
    fc_diff = fnorm + cnorm.T - 2.0 * (x @ new_center.T)
    loss_gpush = jax.nn.relu(-jnp.mean(fc_diff) + 2.0 * loss_center + margin)
    return loss_center, loss_push, loss_gpush, new_center


if __name__ == "__main__":
    B, C, D = 8, 4, 32  # batch, num_class, dim_feature
    key = jax.random.PRNGKey(0)
    kx, ky, kc = jax.random.split(key, 3)
    x = jax.random.normal(kx, (B, D), dtype=jnp.float32)
    y = jax.random.randint(ky, (B,), 0, C, dtype=jnp.int32)
    center0 = jnp.zeros((C, D), jnp.float32)  # StructureLoss.__init__: zero centers

    loss_fn = jax.jit(structure_loss)

    lc, lp, lg, new_center = loss_fn(x, center0, y)
    jax.block_until_ready((lc, lp, lg, new_center))

    rlc, rlp, rlg, rnc = _reference(x, center0, y)
    np.testing.assert_allclose(np.asarray(lc), np.asarray(rlc), rtol=1e-4, atol=1e-4)
    np.testing.assert_allclose(np.asarray(lp), np.asarray(rlp), rtol=1e-4, atol=1e-4)
    np.testing.assert_allclose(np.asarray(lg), np.asarray(rlg), rtol=1e-4, atol=1e-4)
    np.testing.assert_allclose(np.asarray(new_center), np.asarray(rnc),
                               rtol=1e-4, atol=1e-4)

    # second case: non-zero initial centers and an absent class (class 0)
    center1 = jax.random.normal(kc, (C, D), dtype=jnp.float32)
    y2 = jnp.array([1, 2, 3, 1, 2, 3, 1, 2], dtype=jnp.int32)
    lc2, lp2, lg2, nc2 = loss_fn(x, center1, y2)
    jax.block_until_ready((lc2, lp2, lg2, nc2))
    rlc2, rlp2, rlg2, rnc2 = _reference(x, center1, y2)
    np.testing.assert_allclose(np.asarray(lc2), np.asarray(rlc2), rtol=1e-4, atol=1e-4)
    np.testing.assert_allclose(np.asarray(lp2), np.asarray(rlp2), rtol=1e-4, atol=1e-4)
    np.testing.assert_allclose(np.asarray(lg2), np.asarray(rlg2), rtol=1e-4, atol=1e-4)
    np.testing.assert_allclose(np.asarray(nc2), np.asarray(rnc2), rtol=1e-4, atol=1e-4)

    print("KERNEL_OK")
</pallas_src>

<mosaic_0001>
module attributes {stable_mosaic.version = 11 : i64} {
  func.func @_partial_sums_kernel(%arg0: i32, %arg1: i32, %arg2: memref<1x8xi32, #tpu.memory_space<vmem>>, %arg3: memref<8x32xf32, #tpu.memory_space<vmem>>, %arg4: memref<1x4x32xf32, #tpu.memory_space<vmem>>, %arg5: memref<1x1x32xf32, #tpu.memory_space<vmem>>) attributes {dimension_semantics = [#tpu.dimension_semantics<parallel>, #tpu.dimension_semantics<arbitrary>], iteration_bounds = array<i64: 2, 1>, scalar_prefetch = 0 : i64, scratch_operands = 0 : i64, tpu.core_type = #tpu.core_type<tc>, window_params = [{transform_indices = @transform_0, window_bounds = array<i64: 1, 8>}, {transform_indices = @transform_1, window_bounds = array<i64: 8, 32>}, {transform_indices = @transform_2, window_bounds = array<i64: 1, 4, 32>}, {transform_indices = @transform_3, window_bounds = array<i64: 1, 1, 32>}]} {
    %c0_i32 = arith.constant 0 : i32
    %0 = arith.cmpi eq, %arg1, %c0_i32 : i32
    %1 = arith.extui %0 : i1 to i32
    %c0_i32_0 = arith.constant 0 : i32
    %2 = arith.cmpi ne, %1, %c0_i32_0 : i32
    scf.if %2 {
      %cst_20 = arith.constant 0.000000e+00 : f32
      %45 = vector.broadcast %cst_20 : f32 to vector<4x32xf32>
      %c0_21 = arith.constant 0 : index
      %c0_22 = arith.constant 0 : index
      %c0_23 = arith.constant 0 : index
      %46 = vector.load %arg4[%c0_21, %c0_22, %c0_23] : memref<1x4x32xf32, #tpu.memory_space<vmem>>, vector<1x4x32xf32>
      %47 = vector.shape_cast %46 : vector<1x4x32xf32> to vector<4x32xf32>
      %48 = vector.shape_cast %45 : vector<4x32xf32> to vector<1x4x32xf32>
      tpu.vector_store %arg4[%c0_21, %c0_22, %c0_23], %48 {strides = array<i32>} : memref<1x4x32xf32, #tpu.memory_space<vmem>>, vector<1x4x32xf32>,
      %cst_24 = arith.constant 0.000000e+00 : f32
      %49 = vector.broadcast %cst_24 : f32 to vector<1x32xf32>
      %c0_25 = arith.constant 0 : index
      %c0_26 = arith.constant 0 : index
      %c0_27 = arith.constant 0 : index
      %50 = vector.load %arg5[%c0_25, %c0_26, %c0_27] : memref<1x1x32xf32, #tpu.memory_space<vmem>>, vector<1x1x32xf32>
      %51 = vector.shape_cast %50 : vector<1x1x32xf32> to vector<1x32xf32>
      %52 = vector.shape_cast %49 : vector<1x32xf32> to vector<1x1x32xf32>
      tpu.vector_store %arg5[%c0_25, %c0_26, %c0_27], %52 {strides = array<i32>} : memref<1x1x32xf32, #tpu.memory_space<vmem>>, vector<1x1x32xf32>,
    } else {
    }
    %c1_i32 = arith.constant 1 : i32
    %3 = arith.muli %arg0, %c1_i32 : i32
    %4 = arith.addi %3, %arg1 : i32
    %c8_i32 = arith.constant 8 : i32
    %5 = arith.muli %4, %c8_i32 : i32
    %c0 = arith.constant 0 : index
    %c0_1 = arith.constant 0 : index
    %6 = vector.load %arg3[%c0, %c0_1] : memref<8x32xf32, #tpu.memory_space<vmem>>, vector<8x32xf32>
    %c0_2 = arith.constant 0 : index
    %c0_3 = arith.constant 0 : index
    %7 = vector.load %arg2[%c0_2, %c0_3] : memref<1x8xi32, #tpu.memory_space<vmem>>, vector<1x8xi32>
    %8 = tpu.iota {dimensions = array<i32: 0>} : vector<8x1xi32>
    %9 = vector.broadcast %5 : i32 to vector<8x1xi32>
    %10 = arith.addi %8, %9 : vector<8x1xi32>
    %c8_i32_4 = arith.constant 8 : i32
    %11 = vector.broadcast %c8_i32_4 : i32 to vector<8x1xi32>
    %12 = arith.cmpi slt, %10, %11 : vector<8x1xi32>
    %13 = tpu.iota {dimensions = array<i32: 1>} : vector<1x8xi32>
    %14 = vector.broadcast %5 : i32 to vector<1x8xi32>
    %15 = arith.addi %13, %14 : vector<1x8xi32>
    %c8_i32_5 = arith.constant 8 : i32
    %16 = vector.broadcast %c8_i32_5 : i32 to vector<1x8xi32>
    %17 = arith.cmpi slt, %15, %16 : vector<1x8xi32>
    %cst = arith.constant 0.000000e+00 : f32
    %18 = vector.shape_cast %12 : vector<8x1xi1> to vector<8x1xi1>
    %19 = vector.broadcast %18 : vector<8x1xi1> to vector<8x32xi1>
    %20 = vector.broadcast %cst : f32 to vector<8x32xf32>
    %21 = arith.select %19, %6, %20 : vector<8x32xi1>, vector<8x32xf32>
    %22 = tpu.iota {dimensions = array<i32: 0>} : vector<4x8xi32>
    %23 = vector.broadcast %7 : vector<1x8xi32> to vector<4x8xi32>
    %24 = arith.cmpi eq, %22, %23 : vector<4x8xi32>
    %25 = vector.broadcast %17 : vector<1x8xi1> to vector<4x8xi1>
    %26 = arith.andi %24, %25 : vector<4x8xi1>
    %27 = arith.extui %26 : vector<4x8xi1> to vector<4x8xi32>
    %28 = arith.sitofp %27 : vector<4x8xi32> to vector<4x8xf32>
    %c0_6 = arith.constant 0 : index
    %c0_7 = arith.constant 0 : index
    %c0_8 = arith.constant 0 : index
    %29 = vector.load %arg4[%c0_6, %c0_7, %c0_8] : memref<1x4x32xf32, #tpu.memory_space<vmem>>, vector<1x4x32xf32>
    %30 = vector.shape_cast %29 : vector<1x4x32xf32> to vector<4x32xf32>
    %cst_9 = arith.constant dense<0.000000e+00> : vector<4x32xf32>
    %31 = tpu.matmul %28, %21, %cst_9 {dimension_numbers = #tpu.dot_dimension_numbers<[1], [0], [0], [1], [0, 0, 1, 1], [], []>} : vector<4x8xf32>, vector<8x32xf32>, vector<4x32xf32> -> vector<4x32xf32>
    %32 = arith.addf %30, %31 : vector<4x32xf32>
    %c0_10 = arith.constant 0 : index
    %c0_11 = arith.constant 0 : index
    %c0_12 = arith.constant 0 : index
    %33 = vector.load %arg4[%c0_10, %c0_11, %c0_12] : memref<1x4x32xf32, #tpu.memory_space<vmem>>, vector<1x4x32xf32>
    %34 = vector.shape_cast %33 : vector<1x4x32xf32> to vector<4x32xf32>
    %35 = vector.shape_cast %32 : vector<4x32xf32> to vector<1x4x32xf32>
    tpu.vector_store %arg4[%c0_10, %c0_11, %c0_12], %35 {strides = array<i32>} : memref<1x4x32xf32, #tpu.memory_space<vmem>>, vector<1x4x32xf32>,
    %c0_13 = arith.constant 0 : index
    %c0_14 = arith.constant 0 : index
    %c0_15 = arith.constant 0 : index
    %36 = vector.load %arg5[%c0_13, %c0_14, %c0_15] : memref<1x1x32xf32, #tpu.memory_space<vmem>>, vector<1x1x32xf32>
    %37 = vector.shape_cast %36 : vector<1x1x32xf32> to vector<1x32xf32>
    %38 = arith.mulf %21, %21 : vector<8x32xf32>
    %cst_16 = arith.constant dense<0.000000e+00> : vector<32xf32>
    %39 = vector.multi_reduction <add>, %38, %cst_16 [0] : vector<8x32xf32> to vector<32xf32>
    %40 = vector.shape_cast %39 : vector<32xf32> to vector<1x32xf32>
    %41 = arith.addf %37, %40 : vector<1x32xf32>
    %c0_17 = arith.constant 0 : index
    %c0_18 = arith.constant 0 : index
    %c0_19 = arith.constant 0 : index
    %42 = vector.load %arg5[%c0_17, %c0_18, %c0_19] : memref<1x1x32xf32, #tpu.memory_space<vmem>>, vector<1x1x32xf32>
    %43 = vector.shape_cast %42 : vector<1x1x32xf32> to vector<1x32xf32>
    %44 = vector.shape_cast %41 : vector<1x32xf32> to vector<1x1x32xf32>
    tpu.vector_store %arg5[%c0_17, %c0_18, %c0_19], %44 {strides = array<i32>} : memref<1x1x32xf32, #tpu.memory_space<vmem>>, vector<1x1x32xf32>,
    return
  }
  func.func @transform_0(%arg0: i32, %arg1: i32) -> (i32, i32) {
    %c1_i32 = arith.constant 1 : i32
    %0 = arith.muli %arg0, %c1_i32 : i32
    %1 = arith.addi %0, %arg1 : i32
    %c0_i32 = arith.constant 0 : i32
    %2 = arith.minsi %1, %c0_i32 : i32
    %c0_i32_0 = arith.constant 0 : i32
    %c0_i32_1 = arith.constant 0 : i32
    return %c0_i32_0, %2 : i32, i32
  }
  func.func @transform_1(%arg0: i32, %arg1: i32) -> (i32, i32) {
    %c1_i32 = arith.constant 1 : i32
    %0 = arith.muli %arg0, %c1_i32 : i32
    %1 = arith.addi %0, %arg1 : i32
    %c0_i32 = arith.constant 0 : i32
    %2 = arith.minsi %1, %c0_i32 : i32
    %c0_i32_0 = arith.constant 0 : i32
    %c0_i32_1 = arith.constant 0 : i32
    return %2, %c0_i32_0 : i32, i32
  }
  func.func @transform_2(%arg0: i32, %arg1: i32) -> (i32, i32, i32) {
    %c0_i32 = arith.constant 0 : i32
    %c0_i32_0 = arith.constant 0 : i32
    %c0_i32_1 = arith.constant 0 : i32
    return %arg0, %c0_i32, %c0_i32_0 : i32, i32, i32
  }
  func.func @transform_3(%arg0: i32, %arg1: i32) -> (i32, i32, i32) {
    %c0_i32 = arith.constant 0 : i32
    %c0_i32_0 = arith.constant 0 : i32
    %c0_i32_1 = arith.constant 0 : i32
    return %arg0, %c0_i32, %c0_i32_0 : i32, i32, i32
  }
}

</mosaic_0001>

<bundles_post_ra>
// kernel: structure_loss.1
= control target key start
LH: loop header
LB: loop body
LE: loop exit
PB: predicated region body
PF: predicated region fallthrough
CT: control target
= control target key end

     0   :  { %9 = vsyncpa [#allocation3], 0  ;;  %s776_s0 = inlined_call_operand.vmem [shape: s32[1,8], index: 0, kind: input, shape index: {}]   ;;  %s777_s1 = inlined_call_operand.hbm [shape: f32[8,32], index: 1, kind: input, shape index: {}]   ;;  %s778_s2 = inlined_call_operand.vmem [shape: f32[2,4,32], index: 2, kind: output, shape index: {0}]   ;;  %s779_s3 = inlined_call_operand.vmem [shape: f32[2,1,32], index: 3, kind: output, shape index: {1}]  }
   0x1   :  { %11 = vsyncpa [#allocation3 + $0x1], 0  ;;  %s671_s12 = smov 0   ;;  %s673_s13 = smov 0  }
   0x2   :  { %s675_s14 = smov 0   ;;  %s677_s15 = smov 0  }
   0x3   :  { %s679_s16 = smov 0  }
   0x4 LB: > { %s486_s17 = sadd.s32 4294967295, %s646_s16   ;;  %s29_s18 = sadd.s32 1, %s642_s15  ;;  %s646_s16 = sphi %s679_s16, %s17_s16   ;;  %s642_s15 = sphi %s677_s15, %s790_s15   ;;  %s638_s14 = sphi %s675_s14, %s789_s14   ;;  %s634_s13 = sphi %s673_s13, %s766_s13   ;;  %s630_s12 = sphi %s671_s12, %s788_s12  }
   0x5   : > { %p31_p0 = scmp.ge.s32.totalorder %s29_s18, 2  ;;  %p627_p1 = scmp.ne.s32.totalorder %s634_s13, 0 }
   0x6   : > { %p82_p2 = scmp.eq.s32.totalorder %s646_s16, 0  ;;  %p87_p3 = scmp.ne.s32.totalorder %s634_s13, %s630_s12 }
   0x7   : > { %s792_s18 = smov (%p31_p0, %s29_s18), 0  ;;  %p88_p4 = scmp.eq.s32.totalorder %s486_s17, 0 }
   0x8   : > { %p83_p5 = por %p627_p1, %p82_p2  ;;  %p518_p7 = scmp.lt.s32.totalorder %s646_s16, 2 }
   0x9   : > { %p701_p6 = por %p88_p4, %p87_p3  ;;  %s648_s20 = smov [#allocation2]  }
   0xa   : > { %s189_s21 = sshll.u32 %s648_s20, 4  ;;  %p706_p8 = pnand %p518_p7, %p83_p5  ;;  %s190_s21 = int_to_ptr.vmem [resolvable:$true] %s189_s21 }
   0xb   : > { %s782_s19 = scalar_select %p701_p6, 1, 0 }
   0xc   : > { %s783_s22 = scalar_select %p706_p8, 1, 0 }
   0xd   : > { %s569_s25 = scalar_lea.hbm %s777_s1, 128  ;;  %p571_p12 = pneg %p706_p8 }
   0xe   : > { %p570_p11 = scmp.ne.s32.totalorder %s777_s1, %s569_s25  ;;  %p576_p1 = scmp.lt.u32.totalorder %s569_s25, %s569_s25 }
   0xf   : > { %p578_p2 = scmp.lt.u32.totalorder %s569_s25, %s777_s1 }
  0x10   : > { %p572_p13 = pnand %p571_p12, %p570_p11 }
  0x11   : > { %p579_p3 = por %p578_p2, %p576_p1 }
  0x12   : > { %p573_p0 = pneg %p572_p13 }
  0x14   : > { %p580_p4 = pnand %p579_p3, %p573_p0 }
  0x16   : > { %583 = shalt.err (!%p580_p4)
}
  0x17   : > { %s584_s30 = scalar_lea.vmem %s190_s21, 128  ;;  %s591_s4 = scalar_lea.vmem %s190_s21, 256 }
  0x18   : > { %p585_p5 = scmp.ne.s32.totalorder %s190_s21, %s584_s30  ;;  %p592_p10 = scmp.lt.s32.totalorder %s190_s21, %s190_s21 }
  0x19   : > { %p593_p6 = scmp.lt.s32.totalorder %s591_s4, %s584_s30 }
  0x1a   : > { %p587_p7 = pnand %p585_p5, %p571_p12 }
  0x1b   : > { %p594_p8 = por %p593_p6, %p592_p10 }
  0x1c   : > { %p588_p9 = pneg %p587_p7 }
  0x1e   : > { %p595_p11 = pnand %p594_p8, %p588_p9 }
  0x20   : > { %598 = shalt.err (!%p595_p11)
}
  0x21   : > { %p784_p13 = scmp.ne.s32.totalorder %s783_s22, 0  ;;  %p785_p0 = scmp.lt.s32.totalorder %s646_s16, 3 }
  0x22   : > { %p786_p1 = scmp.ge.s32.totalorder %s646_s16, 1 }
  0x23   : > { %517 = dma.hbm_to_vmem [thread:$0]  (!%p784_p13), %s777_s1, 128, %s190_s21, [#allocation3]  }
  0x24   : > { %p195_p2 = pnand %p786_p1, %p785_p0 }
  0x25   : > { %s200_s7 = sand.u32 (!%p195_p2), 1, %s634_s13   ;;  %p787_p6 = scmp.ne.s32.totalorder (!%p195_p2), %s782_s19, 0 }
  0x26   : > { %198 = sbr.rel (%p195_p2) target bundleno = 272 (0x110), region = 28  ;;  %s733_s8 = sshll.u32 (!%p195_p2), %s200_s7, 3 }
  0x27   : > { %s201_s9 = scalar_lea.sflag (!%p195_p2), [#allocation3], %s200_s7  ;;  %s204_s10 = scalar_lea.vmem (!%p195_p2), [#allocation2], %s733_s8 }
  0x2d   : > { %624 = dma.done.wait (%p787_p6), %s201_s9, 128  }
  0x2e   : > { %626 = vsyncadd (%p787_p6), %s201_s9, 4294967168  ;;  %s498_s11 = sshll.u32 %s638_s14, 3  ;;  %v266_v0 = vlaneseq  ;;  %p236_p8 = scmp.lt.s32.totalorder %s638_s14, 0  ;;  %v649_v1 = vmov 0.0   ;;  %vm650_vm0 = vmmov 0   ;;  %vm260_vm1 = vcmask 253952  }
  0x2f   : > { %507 = vmatprep.subr.mxu0 %v649_v1  ;;  %v268_v2 = vstv %s498_s11  ;;  %509 = vmatprep.mubr.msk.f32.mxu0 %vm650_vm0, %v649_v1  ;;  %p247_p9 = scmp.lt.s32.totalorder %s638_s14, 1  ;;  %vm258_vm2 = vcmask 257024   ;;  %v264_v7 = vld [vmem:[%s204_s10] sm:$0xff]  ;;  %vm289_vm6 = vcmask 64512   ;;  %vm368_vm8 = vcmask 261120  }
  0x30   : > { %v267_v3 = vshrl.u32 %v266_v0, 7  ;;  %v272_v4 = vand.u32 127, %v266_v0  ;;  %s237_s12 = scalar_select %p236_p8, %s638_s14, 0 }
  0x31   : > { %s248_s17 = scalar_select %p247_p9, %s638_s14, 1 }
  0x32   : > { %v269_v5 = vadd.s32 %v268_v2, %v267_v3  ;;  %v273_v6 = vadd.s32 %v272_v4, %v268_v2  ;;  %s794_s12 = smov (!%p236_p8, %s237_s12), 0 }
  0x33   : > { %s497_s19 = sshll.u32 %s248_s17, 2  ;;  %s253_s22 = scalar_lea.vmem %s779_s3, %s248_s17 }
  0x34   : > { %vm270_vm3 = vcmp.lt.s32.totalorder %v269_v5, 8  ;;  %vm274_vm4 = vcmp.lt.s32.totalorder %v273_v6, 8  ;;  %s240_s25 = scalar_lea.vmem %s776_s0, %s794_s12  ;;  %s250_s28 = scalar_lea.vmem %s778_s2, %s497_s19  ;;  %261 = vst.msk [vmem:[%s253_s22] sm:$0x1] %vm260_vm1, %v649_v1 }
  0x35   : > { %v499_v8 = vld [vmem:[%s240_s25] ss:$0 sm:$0xff]  ;;  %259 = vst.msk [vmem:[%s250_s28] sm:$0xf] %vm258_vm2, %v649_v1  ;;  %v277_v9 = vsel %vm270_vm3, %v264_v7, 0.0  ;;  %508 = vmatpush3.msk.msra.mxu0 %vm270_vm3, %v264_v7 }
  0x36   : > { %vm282_vm5 = vcmp.eq.s32.totalorder %v267_v3, %v499_v8  ;;  %v367_v11 = vmul.f32 %v277_v9, %v277_v9 }
  0x37   : > { %vm285_vm7 = vmand %vm282_vm5, %vm274_vm4 }
  0x38   : > { %v500_v10 = vsel %vm285_vm7, 1.0, %v649_v1  ;;  %v369_v12 = vsel %vm368_vm8, %v367_v11, 0.0 }
  0x39   : > { %510 = vmatmul.mubr.msk.f32.vlgmr.msra.gmra.mrb[0].mxu0 %vm289_vm6, %v500_v10  ;;  %v370_v13 = vrot.slane %v369_v12, 4 }
  0x3b   : > { %v371_v14 = vadd.f32 %v370_v13, %v369_v12  ;;  %v366_v19 = vld [vmem:[%s253_s22] sm:$0x1] }
  0x3c   : > { %v288_v21 = vld [vmem:[%s250_s28] sm:$0xf] }
  0x3d   : > { %v372_v15 = vrot.slane %v371_v14, 2 }
  0x3f   : > { %v373_v16 = vadd.f32 %v372_v15, %v371_v14 }
  0x41   : > { %v374_v17 = vrot.slane %v373_v16, 1 }
  0x43   : > { %v375_v18 = vadd.f32 %v374_v17, %v373_v16 }
  0x45   : > { %v376_v20 = vadd.f32 %v375_v18, %v366_v19 }
  0x47   : > { %378 = vst.msk [vmem:[%s253_s22] sm:$0x1] %vm260_vm1, %v376_v20 }
 0x10c   : > { %v359_v22 = vpop.f32.mrb[0].mxu0 }
 0x10d   : > { %v363_v23 = vadd.f32 %v359_v22, %v288_v21  ;;  %v511_v24 = vpop.f32.mrb[1].mxu0 }
 0x10f   : > { %365 = vst.msk [vmem:[%s250_s28] sm:$0xf] %vm258_vm2, %v363_v23 }
 0x110 PF: > { %s17_s16 = sadd.s32 1, %s646_s16   ;;  %s788_s12 = smov %s634_s13 }
 0x111   : > { %p14_p10 = scmp.ge.s32.totalorder %s17_s16, 4   ;;  %s766_s13 = smov 0  }
 0x112   : > { %s789_s14 = smov %s642_s15  ;;  %s790_s15 = smov %s792_s18 }
 0x113   :  { %16 = sbr.rel (!%p14_p10) target bundleno = 4 (0x4), region = 87 }
 0x11a   :  { %410 = vsyncpa [#allocation3], 1 }
 0x11b   :  { %412 = vsyncpa [#allocation3 + $0x1], 1 }

</bundles_post_ra>
